<compile_context>
chip_gen: v5e
topology: v5e:2x2
jax: 0.10.0
libtpu: 0.0.40
codegen_flags: <defaults>
</compile_context>

<pallas_src>
import functools

import jax
import jax.numpy as jnp
from jax.experimental import pallas as pl
from jax.experimental.pallas import tpu as pltpu


_LANE = 128


def _round_up(a, b):
    return ((a + b - 1) // b) * b


def _head_kernel(
    x_ref,               # (tm, d_model)                        native dtype (f32/bf16)
    wf_ref, bf_ref,      # (d_model, nc+hidden) bf16, (1, nc+hidden) f32   [wc|w1 fused]
    w2_ref, b2_ref,      # (hidden, hidden) bf16,     (1, hidden) f32
    w3_ref, b3_ref,      # (hidden, num_params) bf16, (1, num_params) f32
    out_ref,             # (nc + num_params, tm)                f32   [probs | curve].T
    *,
    num_classes,
):
    # in-kernel bf16 cast (VPU) — x arrives in its native dtype, read from HBM once
    x = x_ref[...].astype(jnp.bfloat16)

    # ---- fused first layer of both branches (single MXU push) ----
    h0 = jnp.dot(x, wf_ref[...], preferred_element_type=jnp.float32) + bf_ref[...]

    # ---- class branch: softmax over the first num_classes lanes (f32, exact) ----
    logits = h0[:, :num_classes]
    m = jnp.max(logits, axis=-1, keepdims=True)
    e = jnp.exp(logits - m)
    probs = e / jnp.sum(e, axis=-1, keepdims=True)

    # ---- curve branch: ReLU -> Linear -> ReLU -> Linear ----
    h = jnp.maximum(h0[:, num_classes:], 0.0).astype(w2_ref.dtype)
    h = jnp.dot(h, w2_ref[...], preferred_element_type=jnp.float32) + b2_ref[...]
    h = jnp.maximum(h, 0.0).astype(w3_ref.dtype)
    curve = jnp.dot(h, w3_ref[...], preferred_element_type=jnp.float32) + b3_ref[...]

    # ---- single lane-dense transposed store: (tm, n_out) -> (n_out, tm) ----
    merged = jnp.concatenate([probs, curve], axis=-1)       # (tm, n_out) f32
    out_ref[...] = jnp.transpose(merged).astype(out_ref.dtype)


def _choose_tile(M, tm):
    """Row tile (sublane dim of x block, lane dim of the transposed out block)."""
    tm_r = _round_up(tm, _LANE)
    if M <= tm_r:
        if M > 4 * _LANE:
            # enough rows: aim for >= 4 grid steps (>= 2 per TC on v7x) so each
            # core keeps intra-core prefetch/compute overlap.
            tm_eff = _round_up(-(-M // 4), _LANE)
            return tm_eff, -(-M // tm_eff)
        return M, 1          # single full block (block dims == full array dims)
    tm_eff = tm_r
    n_steps = -(-M // tm_eff)
    if n_steps < 4:
        tm_eff = _round_up(-(-M // 4), _LANE)
        n_steps = -(-M // tm_eff)
    return tm_eff, n_steps


def prediction_head(x, params, *, tm=8192):
    """x: (B, S, d_model). Returns (class_probs, curve_params), both f32."""
    B, S, d_model = x.shape
    M = B * S

    wc, bc = params["wc"], params["bc"]
    w1, b1 = params["w1"], params["b1"]
    w2, b2 = params["w2"], params["b2"]
    w3, b3 = params["w3"], params["b3"]
    num_classes = wc.shape[1]
    num_params = w3.shape[1]
    hidden = w1.shape[1]
    n_fused = num_classes + hidden
    n_out = num_classes + num_params

    tm_eff, n_steps = _choose_tile(M, tm)
    Mp = tm_eff * n_steps

    # x: no wrapper-side cast or pad — the kernel reads it once and casts on-chip.
    x2d = x.reshape(M, d_model)

    # Weights are tiny: cast once in the wrapper; DMA'd once (constant-index blocks).
    w_fused = jnp.concatenate([wc, w1], axis=1).astype(jnp.bfloat16)   # (d_model, nc+hidden)
    b_fused = jnp.concatenate([bc, b1], axis=1).astype(jnp.float32)    # (1, nc+hidden)
    w2b = w2.astype(jnp.bfloat16)
    w3b = w3.astype(jnp.bfloat16)
    b2f = b2.astype(jnp.float32)
    b3f = b3.astype(jnp.float32)

    def rep(shape):  # replicated (constant-index) weight / bias block
        return pl.BlockSpec(shape, lambda i: (0, 0))

    grid_spec = pltpu.PrefetchScalarGridSpec(
        num_scalar_prefetch=0,
        grid=(n_steps,),
        in_specs=[
            pl.BlockSpec((tm_eff, d_model), lambda i: (i, 0)),
            rep((d_model, n_fused)), rep((1, n_fused)),
            rep((hidden, hidden)), rep((1, hidden)),
            rep((hidden, num_params)), rep((1, num_params)),
        ],
        # lane-dense, transposed output: last block dim is the (wide) row tile
        out_specs=pl.BlockSpec((n_out, tm_eff), lambda i: (0, i)),
    )

    out_t = pl.pallas_call(
        functools.partial(_head_kernel, num_classes=num_classes),
        grid_spec=grid_spec,
        out_shape=jax.ShapeDtypeStruct((n_out, Mp), jnp.float32),
        compiler_params=pltpu.CompilerParams(
            dimension_semantics=("parallel",),
        ),
    )(x2d, w_fused, b_fused, w2b, b2f, w3b, b3f)

    # wrapper-side layout plumbing on the tiny (n_out, M) slab
    probs = out_t[:num_classes, :M].T.reshape(B, S, num_classes)
    curve = out_t[num_classes:, :M].T.reshape(B, S, num_params)
    return probs, curve


def init_params(key, d_model=32, hidden_dim=32, num_classes=2, num_params=6):
    ks = jax.random.split(key, 8)
    scale = 0.05
    return {
        "wc": scale * jax.random.normal(ks[0], (d_model, num_classes), jnp.float32),
        "bc": scale * jax.random.normal(ks[1], (1, num_classes), jnp.float32),
        "w1": scale * jax.random.normal(ks[2], (d_model, hidden_dim), jnp.float32),
        "b1": scale * jax.random.normal(ks[3], (1, hidden_dim), jnp.float32),
        "w2": scale * jax.random.normal(ks[4], (hidden_dim, hidden_dim), jnp.float32),
        "b2": scale * jax.random.normal(ks[5], (1, hidden_dim), jnp.float32),
        "w3": scale * jax.random.normal(ks[6], (hidden_dim, num_params), jnp.float32),
        "b3": scale * jax.random.normal(ks[7], (1, num_params), jnp.float32),
    }


def _reference(x, p):
    logits = x @ p["wc"] + p["bc"][0]
    probs = jax.nn.softmax(logits, axis=-1)
    h = jax.nn.relu(x @ p["w1"] + p["b1"][0])
    h = jax.nn.relu(h @ p["w2"] + p["b2"][0])
    curve = h @ p["w3"] + p["b3"][0]
    return probs, curve


if __name__ == "__main__":
    key = jax.random.PRNGKey(0)
    k_x, k_p = jax.random.split(key)

    B, S, d_model = 2, 8, 32
    x = jax.random.normal(k_x, (B, S, d_model), jnp.float32)
    params = init_params(k_p, d_model=d_model, hidden_dim=32,
                         num_classes=2, num_params=6)

    probs, curve = prediction_head(x, params)
    jax.block_until_ready((probs, curve))

    ref_probs, ref_curve = _reference(x, params)
    # bf16 matmul inputs (f32 accumulation) -> relaxed tolerance vs f32 reference.
    assert probs.shape == (B, S, 2) and curve.shape == (B, S, 6)
    assert jnp.max(jnp.abs(probs - ref_probs)) < 2e-2
    assert jnp.max(jnp.abs(curve - ref_curve)) < 2e-2

    print("KERNEL_OK")
</pallas_src>

<mosaic_0001>
module attributes {stable_mosaic.version = 11 : i64} {
  func.func @_head_kernel(%arg0: i32, %arg1: memref<16x32xf32, #tpu.memory_space<vmem>>, %arg2: memref<32x34xbf16, #tpu.memory_space<vmem>>, %arg3: memref<1x34xf32, #tpu.memory_space<vmem>>, %arg4: memref<32x32xbf16, #tpu.memory_space<vmem>>, %arg5: memref<1x32xf32, #tpu.memory_space<vmem>>, %arg6: memref<32x6xbf16, #tpu.memory_space<vmem>>, %arg7: memref<1x6xf32, #tpu.memory_space<vmem>>, %arg8: memref<8x16xf32, #tpu.memory_space<vmem>>) attributes {dimension_semantics = [#tpu.dimension_semantics<parallel>], iteration_bounds = array<i64: 1>, scalar_prefetch = 0 : i64, scratch_operands = 0 : i64, tpu.core_type = #tpu.core_type<tc>, window_params = [{transform_indices = @transform_0, window_bounds = array<i64: 16, 32>}, {pipeline_mode = #tpu.pipeline_mode<synchronous>, transform_indices = @transform_1, window_bounds = array<i64: 32, 34>}, {pipeline_mode = #tpu.pipeline_mode<synchronous>, transform_indices = @transform_2, window_bounds = array<i64: 1, 34>}, {pipeline_mode = #tpu.pipeline_mode<synchronous>, transform_indices = @transform_3, window_bounds = array<i64: 32, 32>}, {pipeline_mode = #tpu.pipeline_mode<synchronous>, transform_indices = @transform_4, window_bounds = array<i64: 1, 32>}, {pipeline_mode = #tpu.pipeline_mode<synchronous>, transform_indices = @transform_5, window_bounds = array<i64: 32, 6>}, {pipeline_mode = #tpu.pipeline_mode<synchronous>, transform_indices = @transform_6, window_bounds = array<i64: 1, 6>}, {transform_indices = @transform_7, window_bounds = array<i64: 8, 16>}]} {
    %c0 = arith.constant 0 : index
    %c0_0 = arith.constant 0 : index
    %0 = vector.load %arg1[%c0, %c0_0] : memref<16x32xf32, #tpu.memory_space<vmem>>, vector<16x32xf32>
    %1 = arith.truncf %0 : vector<16x32xf32> to vector<16x32xbf16>
    %c0_1 = arith.constant 0 : index
    %c0_2 = arith.constant 0 : index
    %2 = vector.load %arg2[%c0_1, %c0_2] : memref<32x34xbf16, #tpu.memory_space<vmem>>, vector<32x34xbf16>
    %cst = arith.constant dense<0.000000e+00> : vector<16x34xf32>
    %3 = tpu.matmul %1, %2, %cst {dimension_numbers = #tpu.dot_dimension_numbers<[1], [0], [0], [1], [0, 0, 1, 1], [], []>} : vector<16x32xbf16>, vector<32x34xbf16>, vector<16x34xf32> -> vector<16x34xf32>
    %c0_3 = arith.constant 0 : index
    %c0_4 = arith.constant 0 : index
    %4 = vector.load %arg3[%c0_3, %c0_4] : memref<1x34xf32, #tpu.memory_space<vmem>>, vector<1x34xf32>
    %5 = vector.broadcast %4 : vector<1x34xf32> to vector<16x34xf32>
    %6 = arith.addf %3, %5 : vector<16x34xf32>
    %7 = vector.extract_strided_slice %6 {offsets = [0, 0], sizes = [16, 2], strides = [1, 1]} : vector<16x34xf32> to vector<16x2xf32>
    %cst_5 = arith.constant dense<0xFF800000> : vector<16xf32>
    %8 = vector.multi_reduction <maximumf>, %7, %cst_5 [1] : vector<16x2xf32> to vector<16xf32>
    %9 = vector.shape_cast %8 : vector<16xf32> to vector<16x1xf32>
    %10 = vector.broadcast %9 : vector<16x1xf32> to vector<16x2xf32>
    %11 = arith.subf %7, %10 : vector<16x2xf32>
    %12 = math.exp %11 : vector<16x2xf32>
    %cst_6 = arith.constant dense<0.000000e+00> : vector<16xf32>
    %13 = vector.multi_reduction <add>, %12, %cst_6 [1] : vector<16x2xf32> to vector<16xf32>
    %14 = vector.shape_cast %13 : vector<16xf32> to vector<16x1xf32>
    %15 = vector.broadcast %14 : vector<16x1xf32> to vector<16x2xf32>
    %16 = arith.divf %12, %15 : vector<16x2xf32>
    %17 = vector.extract_strided_slice %6 {offsets = [0, 2], sizes = [16, 32], strides = [1, 1]} : vector<16x34xf32> to vector<16x32xf32>
    %cst_7 = arith.constant 0.000000e+00 : f32
    %18 = vector.broadcast %cst_7 : f32 to vector<16x32xf32>
    %19 = arith.maximumf %17, %18 : vector<16x32xf32>
    %20 = arith.truncf %19 : vector<16x32xf32> to vector<16x32xbf16>
    %c0_8 = arith.constant 0 : index
    %c0_9 = arith.constant 0 : index
    %21 = vector.load %arg4[%c0_8, %c0_9] : memref<32x32xbf16, #tpu.memory_space<vmem>>, vector<32x32xbf16>
    %cst_10 = arith.constant dense<0.000000e+00> : vector<16x32xf32>
    %22 = tpu.matmul %20, %21, %cst_10 {dimension_numbers = #tpu.dot_dimension_numbers<[1], [0], [0], [1], [0, 0, 1, 1], [], []>} : vector<16x32xbf16>, vector<32x32xbf16>, vector<16x32xf32> -> vector<16x32xf32>
    %c0_11 = arith.constant 0 : index
    %c0_12 = arith.constant 0 : index
    %23 = vector.load %arg5[%c0_11, %c0_12] : memref<1x32xf32, #tpu.memory_space<vmem>>, vector<1x32xf32>
    %24 = vector.broadcast %23 : vector<1x32xf32> to vector<16x32xf32>
    %25 = arith.addf %22, %24 : vector<16x32xf32>
    %cst_13 = arith.constant 0.000000e+00 : f32
    %26 = vector.broadcast %cst_13 : f32 to vector<16x32xf32>
    %27 = arith.maximumf %25, %26 : vector<16x32xf32>
    %28 = arith.truncf %27 : vector<16x32xf32> to vector<16x32xbf16>
    %c0_14 = arith.constant 0 : index
    %c0_15 = arith.constant 0 : index
    %29 = vector.load %arg6[%c0_14, %c0_15] : memref<32x6xbf16, #tpu.memory_space<vmem>>, vector<32x6xbf16>
    %cst_16 = arith.constant dense<0.000000e+00> : vector<16x6xf32>
    %30 = tpu.matmul %28, %29, %cst_16 {dimension_numbers = #tpu.dot_dimension_numbers<[1], [0], [0], [1], [0, 0, 1, 1], [], []>} : vector<16x32xbf16>, vector<32x6xbf16>, vector<16x6xf32> -> vector<16x6xf32>
    %c0_17 = arith.constant 0 : index
    %c0_18 = arith.constant 0 : index
    %31 = vector.load %arg7[%c0_17, %c0_18] : memref<1x6xf32, #tpu.memory_space<vmem>>, vector<1x6xf32>
    %32 = vector.broadcast %31 : vector<1x6xf32> to vector<16x6xf32>
    %33 = arith.addf %30, %32 : vector<16x6xf32>
    %34 = tpu.concatenate %16, %33 in 1 : vector<16x2xf32>, vector<16x6xf32> -> vector<16x8xf32>
    %35 = tpu.transpose %34, [1, 0] : vector<16x8xf32> -> vector<8x16xf32>
    %c0_19 = arith.constant 0 : index
    %c0_20 = arith.constant 0 : index
    %36 = vector.load %arg8[%c0_19, %c0_20] : memref<8x16xf32, #tpu.memory_space<vmem>>, vector<8x16xf32>
    tpu.vector_store %arg8[%c0_19, %c0_20], %35 {strides = array<i32>} : memref<8x16xf32, #tpu.memory_space<vmem>>, vector<8x16xf32>,
    return
  }
  func.func @transform_0(%arg0: i32) -> (i32, i32) {
    %c0_i32 = arith.constant 0 : i32
    %c0_i32_0 = arith.constant 0 : i32
    return %arg0, %c0_i32 : i32, i32
  }
  func.func @transform_1(%arg0: i32) -> (i32, i32) {
    %c0_i32 = arith.constant 0 : i32
    %c0_i32_0 = arith.constant 0 : i32
    %c0_i32_1 = arith.constant 0 : i32
    return %c0_i32, %c0_i32_0 : i32, i32
  }
  func.func @transform_2(%arg0: i32) -> (i32, i32) {
    %c0_i32 = arith.constant 0 : i32
    %c0_i32_0 = arith.constant 0 : i32
    %c0_i32_1 = arith.constant 0 : i32
    return %c0_i32, %c0_i32_0 : i32, i32
  }
  func.func @transform_3(%arg0: i32) -> (i32, i32) {
    %c0_i32 = arith.constant 0 : i32
    %c0_i32_0 = arith.constant 0 : i32
    %c0_i32_1 = arith.constant 0 : i32
    return %c0_i32, %c0_i32_0 : i32, i32
  }
  func.func @transform_4(%arg0: i32) -> (i32, i32) {
    %c0_i32 = arith.constant 0 : i32
    %c0_i32_0 = arith.constant 0 : i32
    %c0_i32_1 = arith.constant 0 : i32
    return %c0_i32, %c0_i32_0 : i32, i32
  }
  func.func @transform_5(%arg0: i32) -> (i32, i32) {
    %c0_i32 = arith.constant 0 : i32
    %c0_i32_0 = arith.constant 0 : i32
    %c0_i32_1 = arith.constant 0 : i32
    return %c0_i32, %c0_i32_0 : i32, i32
  }
  func.func @transform_6(%arg0: i32) -> (i32, i32) {
    %c0_i32 = arith.constant 0 : i32
    %c0_i32_0 = arith.constant 0 : i32
    %c0_i32_1 = arith.constant 0 : i32
    return %c0_i32, %c0_i32_0 : i32, i32
  }
  func.func @transform_7(%arg0: i32) -> (i32, i32) {
    %c0_i32 = arith.constant 0 : i32
    %c0_i32_0 = arith.constant 0 : i32
    return %c0_i32, %arg0 : i32, i32
  }
}

</mosaic_0001>

<bundles_post_ra>
// kernel: tpu_custom_call.1
= control target key start
LH: loop header
LB: loop body
LE: loop exit
PB: predicated region body
PF: predicated region fallthrough
CT: control target
= control target key end

     0   :  { %12 = vsyncpa [#allocation3], 0  ;;  %s515_s0 = inlined_call_operand.vmem [shape: f32[16,32], index: 0, kind: input, shape index: {}]   ;;  %s516_s1 = inlined_call_operand.hbm [shape: bf16[32,34], index: 1, kind: input, shape index: {}]   ;;  %s517_s2 = inlined_call_operand.vmem [shape: f32[1,34], index: 2, kind: input, shape index: {}]   ;;  %s518_s3 = inlined_call_operand.hbm [shape: bf16[32,32], index: 3, kind: input, shape index: {}]   ;;  %s519_s4 = inlined_call_operand.vmem [shape: f32[1,32], index: 4, kind: input, shape index: {}]   ;;  %s520_s5 = inlined_call_operand.vmem [shape: bf16[32,6], index: 5, kind: input, shape index: {}]   ;;  %s521_s6 = inlined_call_operand.vmem [shape: f32[1,6], index: 6, kind: input, shape index: {}]   ;;  %s522_s7 = inlined_call_operand.hbm [shape: f32[8,16], index: 7, kind: output, shape index: {}]  }
   0x1   :  { %13 = vsyncpa [#allocation6], 0 }
   0x2   :  { %14 = vsyncpa [#allocation4], 0  ;;  %s21_s26 = sshll.u32 %s516_s1, 4  ;;  %s425_s27 = smov [#allocation2]   ;;  %s22_s26 = int_to_ptr.hbm [resolvable:$true] %s21_s26 }
   0x3   :  { %s23_s28 = sshll.u32 %s425_s27, 4  ;;  %s36_s8 = sshll.u32 %s518_s3, 4  ;;  %s24_s28 = int_to_ptr.vmem [resolvable:$true] %s23_s28  ;;  %s37_s8 = int_to_ptr.hbm [resolvable:$true] %s36_s8 }
   0x4   :  { %s426_s9 = smov 64   ;;  %s427_s10 = smov 4  }
   0x5   :  { %29 = dma.hbm_to_vmem [thread:$0]  %s22_s26, 256, %s24_s28, [#allocation3], %s426_s9, %s426_s9, %s427_s10  }
   0x6   :  { %s428_s11 = smov [#allocation5]  }
   0x7   :  { %s38_s12 = sshll.u32 %s428_s11, 4  ;;  %s39_s12 = int_to_ptr.vmem [resolvable:$true] %s38_s12 }
   0x8   :  { %44 = dma.hbm_to_vmem [thread:$0]  %s37_s8, 256, %s39_s12, [#allocation6], %s426_s9, %s426_s9, %s427_s10  }
   0x9   :  { %419 = dma.done.wait [#allocation3], 256  }
   0xa   :  { %420 = vsyncadd [#allocation3], 4294967040 }
   0xb   :  { %421 = dma.done.wait [#allocation6], 256  }
   0xc   :  { %422 = vsyncadd [#allocation6], 4294967040  ;;  %v323_v0 = vld [vmem:[#allocation2 + $0x8] sm:$0xff]  ;;  %v322_v1 = vld [vmem:[#allocation2] sm:$0xff]  ;;  %vm83_vm0 = vcmask 261120   ;;  %vm101_vm1 = vcmask 15360  }
   0xd   :  { %v60_v2 = vld [vmem:[%s515_s0] sm:$0xff]  ;;  %93 = vmatpush.bf16.msra.mxu0 %v323_v0  ;;  %v61_v3 = vld [vmem:[%s515_s0 + $0x8] sm:$0xff]  ;;  %s429_s0 = smov 126   ;;  %v325_v14 = vld [vmem:[#allocation5 + $0x8] sm:$0xff]  ;;  %s284_s26 = sshll.u32 %s522_s7, 4  ;;  %vm275_vm10 = vcmask 130048   ;;  %s285_s26 = int_to_ptr.hbm [resolvable:$true] %s284_s26 }
   0xe   :  { %v62_v4 = vpack.c.bf16 %v61_v3, %v60_v2  ;;  %v336_v6 = vld [vmem:[%s517_s2] ss:$0 sm:$0xff]  ;;  %185 = vmatpush.bf16.msra.mxu1 %v325_v14  ;;  %v324_v15 = vld [vmem:[#allocation5] sm:$0xff]  ;;  %v327_v28 = vld [vmem:[%s520_s5 + $0x8] sm:$0xff] }
   0xf   :  { %225 = vmatpush.bf16.msra.mxu2 %v327_v28  ;;  %v326_v29 = vld [vmem:[%s520_s5] sm:$0xff]  ;;  %s430_s5 = smov 2  }
  0x10   :  { %v337_v31 = vld [vmem:[%s519_s4] ss:$0 sm:$0xff]  ;;  %s431_s4 = smov [#allocation7]  }
  0x11   :  { %94 = vmatpush.bf16.msra.mxu0 %v322_v1  ;;  %v338_v38 = vld [vmem:[%s521_s6] ss:$0 sm:$0xff]  ;;  %s282_s6 = sshll.u32 %s431_s4, 4  ;;  %s283_s6 = int_to_ptr.vmem [resolvable:$true] %s282_s6 }
  0x12   :  { %186 = vmatpush.bf16.msra.mxu1 %v324_v15 }
  0x13   :  { %226 = vmatpush.bf16.msra.mxu2 %v326_v29 }
  0x14   :  { %303 = vmatmul.msk.bf16.vlgmr.msra.gmra.mxu0 %vm83_vm0, %v62_v4 }
  0x91   :  { %v96_v5 = vpop.f32.mrf.mxu0 }
  0x92   :  { %v97_v7 = vadd.f32 %v336_v6, %v96_v5 }
  0x94   :  { %v150_v11 = vmax.f32 %v97_v7, 0.0  ;;  %v102_v16 = vsel %vm101_vm1, %v97_v7, -inf }
  0x99   :  { %v98_v8 = vpop.f32.mrf.mxu0 }
  0x9a   :  { %v99_v9 = vadd.f32 %v336_v6, %v98_v8 }
  0x9c   :  { %v105_v10 = vsel %vm101_vm1, %v99_v9, -inf  ;;  %v151_v12 = vmax.f32 %v99_v9, 0.0 }
  0x9d   :  { %106 = vmax.xlane.f32.xlu1 %v105_v10 }
  0x9e   :  { %v152_v13 = vpack.c.bf16 %v151_v12, %v150_v11 }
  0xa0   :  { %162 = vrot.lane.b32.xlu0 %v152_v13, %s429_s0 }
  0xca   :  { %103 = vmax.xlane.f32.xlu0 %v102_v16 }
 0x110   :  { %v107_v17 = vpop.xlane.xlu1 %106 }
 0x111   :  { %v109_v18 = vsub.f32 %v99_v9, %v107_v17 }
 0x112   :  { %v163_v19 = vpop.permute.xlu0 %162 }
 0x113   :  { %v112_v20 = vmul.f32 1.442695, %v109_v18  ;;  %312 = vmatmul.msk.bf16.vlgmr.msra.gmra.mxu1 %vm83_vm0, %v163_v19 }
 0x115   :  { %339 = vpow2.f32 %v112_v20 }
 0x11b   :  { %v491_v21 = vpop.eup %339 }
 0x11c   :  { %v117_v22 = vsel %vm101_vm1, %v491_v21, 0.0 }
 0x11d   :  { %118 = vadd.xlane.f32.xlu2 %v117_v22 }
 0x13d   :  { %v104_v23 = vpop.xlane.xlu0 %103 }
 0x13e   :  { %v108_v24 = vsub.f32 %v97_v7, %v104_v23 }
 0x140   :  { %v110_v25 = vmul.f32 1.442695, %v108_v24 }
 0x142   :  { %341 = vpow2.f32 %v110_v25 }
 0x148   :  { %v342_v26 = vpop.eup %341 }
 0x149   :  { %v114_v27 = vsel %vm101_vm1, %v342_v26, 0.0 }
 0x14a   :  { %115 = vadd.xlane.f32.xlu1 %v114_v27 }
 0x190   :  { %v188_v30 = vpop.f32.mrf.mxu1  ;;  %v119_v51 = vpop.xlane.xlu2 %118 }
 0x191   :  { %v189_v32 = vadd.f32 %v337_v31, %v188_v30  ;;  %v146_v63 = vand.u32 2147483648, %v119_v51  ;;  %vm140_vm7 = vweird.f32 %v119_v51  ;;  %v144_v0 = vand.u32 2147483647, %v119_v51 }
 0x193   :  { %v193_v35 = vmax.f32 %v189_v32, 0.0  ;;  %v147_v2 = vor.u32 1.1754944e-38, %v146_v63  ;;  %vm145_vm9 = vcmp.eq.f32.partialorder %v144_v0, 8.507059e+37 }
 0x198   :  { %v190_v33 = vpop.f32.mrf.mxu1 }
 0x199   :  { %v191_v34 = vadd.f32 %v337_v31, %v190_v33 }
 0x19b   :  { %v194_v36 = vmax.f32 %v191_v34, 0.0 }
 0x19d   :  { %v195_v37 = vpack.c.bf16 %v194_v36, %v193_v35 }
 0x19f   :  { %321 = vmatmul.msk.bf16.vlgmr.msra.gmra.mxu2 %vm83_vm0, %v195_v37 }
 0x1bd   :  { %v116_v43 = vpop.xlane.xlu1 %115 }
 0x1be   :  { %343 = vrcp.f32 %v116_v43  ;;  %v131_v49 = vand.u32 2147483648, %v116_v43  ;;  %vm125_vm3 = vweird.f32 %v116_v43  ;;  %v129_v50 = vand.u32 2147483647, %v116_v43 }
 0x1bf   :  { %345 = vrcp.f32 %v119_v51 }
 0x1c0   :  { %v132_v53 = vor.u32 1.1754944e-38, %v131_v49  ;;  %vm130_vm5 = vcmp.eq.f32.partialorder %v129_v50, 8.507059e+37 }
 0x1c4   :  { %v344_v44 = vpop.eup %343 }
 0x1c5   :  { %v121_v45 = vmul.f32 %v344_v44, %v116_v43  ;;  %vm126_vm2 = vweird.f32 %v344_v44  ;;  %v346_v58 = vpop.eup %345 }
 0x1c6   :  { %vm127_vm4 = vmor %vm125_vm3, %vm126_vm2  ;;  %v136_v59 = vmul.f32 %v346_v58, %v119_v51  ;;  %vm141_vm6 = vweird.f32 %v346_v58 }
 0x1c7   :  { %v122_v46 = vsub.f32 1.0, %v121_v45  ;;  %vm142_vm8 = vmor %vm140_vm7, %vm141_vm6 }
 0x1c8   :  { %v137_v60 = vsub.f32 1.0, %v136_v59 }
 0x1c9   :  { %v123_v47 = vmul.f32 %v344_v44, %v122_v46 }
 0x1ca   :  { %v138_v61 = vmul.f32 %v346_v58, %v137_v60 }
 0x1cb   :  { %v124_v48 = vadd.f32 %v344_v44, %v123_v47 }
 0x1cc   :  { %v139_v62 = vadd.f32 %v346_v58, %v138_v61 }
 0x1cd   :  { %v128_v52 = vsel %vm127_vm4, %v344_v44, %v124_v48 }
 0x1ce   :  { %v133_v54 = vsel %vm130_vm5, %v132_v53, %v128_v52  ;;  %v143_v1 = vsel %vm142_vm8, %v346_v58, %v139_v62 }
 0x1cf   :  { %v134_v55 = vmul.f32 %v342_v26, %v133_v54  ;;  %v148_v3 = vsel %vm145_vm9, %v147_v2, %v143_v1 }
 0x1d0   :  { %v149_v4 = vmul.f32 %v491_v21, %v148_v3 }
 0x222   :  { %v228_v39 = vpop.f32.mrf.mxu2 }
 0x223   :  { %v229_v40 = vadd.f32 %v338_v38, %v228_v39 }
 0x225   :  { %235 = vrot.lane.b32.xlu2 %v229_v40, %s430_s5 }
 0x22a   :  { %v230_v41 = vpop.f32.mrf.mxu2 }
 0x22b   :  { %v231_v42 = vadd.f32 %v338_v38, %v230_v41 }
 0x22d   :  { %237 = vrot.lane.b32.xlu1 %v231_v42, %s430_s5 }
 0x27f   :  { %v236_v56 = vpop.permute.xlu2 %235 }
 0x280   :  { %v241_v57 = vsel %vm101_vm1, %v134_v55, %v236_v56 }
 0x281   :  { %243 = vxpose.xlu2.b32.start [1/2] (short) (narrow) %v241_v57, 8 }
 0x29f   :  { %v238_v5 = vpop.permute.xlu1 %237 }
 0x2a0   :  { %v242_v6 = vsel %vm101_vm1, %v149_v4, %v238_v5 }
 0x2a1   :  { %244 = vxpose.xlu2.b32.end [2/2] (short) (narrow) %v242_v6, 8 }
 0x332   :  { %v259_v7 = vpop.trf.xlu2 }
 0x333   :  { %276 = vst.msk [vmem:[#allocation7] sm:$0xff] %vm275_vm10, %v259_v7 }
 0x334   :  { %287 = dma.vmem_to_hbm [thread:$0]  %s283_s6, 128, %s285_s26, [#allocation4]  }
 0x335   :  { %423 = dma.done.wait [#allocation4], 128  }
 0x336   :  { %424 = vsyncadd [#allocation4], 4294967168 }
 0x337   :  { %292 = vsyncpa [#allocation3], 1 }
 0x338   :  { %293 = vsyncpa [#allocation6], 1 }
 0x339   :  { %294 = vsyncpa [#allocation4], 1 }

</bundles_post_ra>
